<compile_context>
chip_gen: v5e
topology: v5e:2x2
jax: 0.10.0
libtpu: 0.0.40
codegen_flags: <defaults>
</compile_context>

<pallas_src>
import functools

import numpy as np
import jax
import jax.numpy as jnp
from jax.experimental import pallas as pl
from jax.experimental.pallas import tpu as pltpu

LANE = 128
SUB = 8
OUT_FEATURES = 6          # fc3 = nn.Linear(84, 6)
NB_MAX = 128              # padded-batch rows per grid step (fits v5e/v6e/v7x VMEM)


def _round_up(x, m):
    return (x + m - 1) // m * m


def _pad2(a, rows, cols):
    return jnp.pad(a, ((0, rows - a.shape[0]), (0, cols - a.shape[1])))


# ---------------------------------------------------------------------------
# Fused kernel: one batch tile of NB (padded) examples per grid step.
# ---------------------------------------------------------------------------
def convnet_kernel(p1_ref, w1_ref, b1_ref, w2_ref, b2_ref,
                   wf1_ref, bf1_ref, wf2_ref, bf2_ref, wf3_ref, bf3_ref,
                   o_ref, *, nb):
    """Whole forward pass for one batch tile, entirely in VMEM.

    p1:  (64*nb, 128) bf16  merged conv1 im2col patches for this tile,
                            rows = (pool_pos, ph, pw, n_in_tile), cols=(cin,ki,kj) pad
    w1:  (128, 128)  bf16   conv1 weight (18 valid K rows, 6 valid N lanes)
    b1:  (1, 128)    f32
    w2:  (128, 128)  bf16   conv2 weight, row = tap*6 + cin (54 valid rows, 16 lanes)
    b2:  (1, 128)    f32
    wf*: (128, 128)  bf16   fc weights in x @ W.T layout; bf*: (1, 128) f32
    o:   (nb, 128)   f32    fc3 output (6 valid lanes)
    """
    NB = nb
    R1 = 16 * NB          # pooled conv1 rows in this tile: (ph, pw, n), ph,pw in [0,4)

    # ---- conv1: one MXU matmul over all 4 pool positions + bias + ReLU ----
    o1 = jnp.dot(p1_ref[...], w1_ref[...], preferred_element_type=jnp.float32)
    o1 = jnp.maximum(o1 + b1_ref[...], 0.0)                        # (64*NB, 128) f32
    # 2x2 max-pool == max over the 4 pool-position row groups (aligned slices)
    h1 = jnp.maximum(jnp.maximum(o1[0:R1], o1[R1:2 * R1]),
                     jnp.maximum(o1[2 * R1:3 * R1], o1[3 * R1:4 * R1]))
    # h1: (16*NB, 128), rows (ph, pw, n).
    # INVARIANT: h1 lanes 6..127 are EXACTLY zero (w1/b1 are zero-padded and
    # ReLU(0)=0).  The single-K-block conv2 packing below depends on this.

    # ---- conv2: pack the nine 3x3 taps into a single K=128 block ----
    # Tap t=(ki,kj) contributes its 6 channels at lanes 6*t..6*t+5 via an XLU
    # lane rotate; the sum is exact because the shifted blocks occupy disjoint
    # (otherwise zero) lanes.  One (4*NB,128)x(128,128) matmul replaces the
    # old K=9*128 contraction (~9x less MXU work, 9x less w2 DMA).
    lhs2 = None
    for ki in range(3):
        for kj in range(3):
            t = ki * 3 + kj
            top = h1[(ki * 4 + kj) * NB:(ki * 4 + kj + 2) * NB]              # out a2 = 0
            bot = h1[((ki + 1) * 4 + kj) * NB:((ki + 1) * 4 + kj + 2) * NB]  # out a2 = 1
            tap = jnp.concatenate([top, bot], axis=0)                        # (4*NB, 128)
            if t:
                tap = pltpu.roll(tap, shift=6 * t, axis=1)
            lhs2 = tap if lhs2 is None else lhs2 + tap
    o2 = jnp.dot(lhs2.astype(jnp.bfloat16), w2_ref[...],
                 preferred_element_type=jnp.float32)
    o2 = jnp.maximum(o2 + b2_ref[...], 0.0)          # (4*NB, 128), rows (a2, b2, n)
    # conv2's 2x2 output is one pool window -> 4-way max == flatten to (N, 16)
    feat = jnp.maximum(jnp.maximum(o2[0:NB], o2[NB:2 * NB]),
                       jnp.maximum(o2[2 * NB:3 * NB], o2[3 * NB:4 * NB]))    # (NB, 128)

    # ---- fc1 -> ReLU -> fc2 -> ReLU -> fc3, fused in VMEM ----
    h = jnp.maximum(
        jnp.dot(feat.astype(jnp.bfloat16), wf1_ref[...],
                preferred_element_type=jnp.float32) + bf1_ref[...], 0.0)
    h = jnp.maximum(
        jnp.dot(h.astype(jnp.bfloat16), wf2_ref[...],
                preferred_element_type=jnp.float32) + bf2_ref[...], 0.0)
    o_ref[...] = (jnp.dot(h.astype(jnp.bfloat16), wf3_ref[...],
                          preferred_element_type=jnp.float32) + bf3_ref[...])


# ---------------------------------------------------------------------------
# One-time parameter preprocessing (hoisted out of the per-call forward)
# ---------------------------------------------------------------------------
def prepare_params(p):
    """Pad/reorder PyTorch-layout params into bf16 MXU tiles. Call once, reuse.

    NOTE: w1/b1 MUST stay zero beyond output lane 5 -- the kernel's conv2
    K-packing relies on the padded conv1 output lanes being exactly zero."""
    f32, bf16 = jnp.float32, jnp.bfloat16
    # conv1: (6, 2, 3, 3) -> K = (cin, ki, kj) = 18, N = cout = 6
    w1 = _pad2(p["conv1_w"].reshape(6, 18).T, LANE, LANE).astype(bf16)
    b1 = _pad2(p["conv1_b"].reshape(1, -1).astype(f32), 1, LANE)
    # conv2: (16, 6, 3, 3) -> row = tap*6 + cin (tap = ki*3 + kj), col = cout
    w2 = jnp.transpose(p["conv2_w"], (2, 3, 1, 0)).reshape(54, 16)
    w2 = _pad2(w2, LANE, LANE).astype(bf16)
    b2 = _pad2(p["conv2_b"].reshape(1, -1).astype(f32), 1, LANE)
    # fc weights in x @ W.T layout
    wf1 = _pad2(p["fc1_w"].T, LANE, LANE).astype(bf16)
    bf1 = _pad2(p["fc1_b"].reshape(1, -1).astype(f32), 1, LANE)
    wf2 = _pad2(p["fc2_w"].T, LANE, LANE).astype(bf16)
    bf2 = _pad2(p["fc2_b"].reshape(1, -1).astype(f32), 1, LANE)
    wf3 = _pad2(p["fc3_w"].T, LANE, LANE).astype(bf16)
    bf3 = _pad2(p["fc3_b"].reshape(1, -1).astype(f32), 1, LANE)
    return dict(w1=w1, b1=b1, w2=w2, b2=b2, wf1=wf1, bf1=bf1,
                wf2=wf2, bf2=bf2, wf3=wf3, bf3=bf3)


# ---------------------------------------------------------------------------
# Per-call glue: conv1 im2col patches, batch-tiled
# ---------------------------------------------------------------------------
def _conv1_patches(x, n_pad, nb):
    """(N, 2, 10, 10) -> (n_pad//nb, 64*nb, 18) merged conv1 im2col patches.

    Per tile, row order = (pool_pos=(a,b), ph, pw, n_in_tile); column order =
    (cin, ki, kj) to match conv1_w.reshape(6, 18)."""
    # TODO(synk): patch extraction stays as wrapper-side XLA glue; in-kernel
    # im2col from the raw (N,2,10,10) input would need unaligned sub-lane
    # gathers and is not worth it at this size.
    N, C, H, W = x.shape
    Ho, Wo = H - 2, W - 2
    Hp, Wp = Ho // 2, Wo // 2
    cols = jnp.stack([x[:, :, ki:ki + Ho, kj:kj + Wo]
                      for ki in range(3) for kj in range(3)], axis=2)   # (N,C,9,Ho,Wo)
    cols = cols.reshape(N, C * 9, Ho, Wo)
    cols = jnp.transpose(cols, (2, 3, 0, 1))                            # (Ho,Wo,N,C*9)
    cols = jnp.pad(cols, ((0, 0), (0, 0), (0, n_pad - N), (0, 0)))
    pos = jnp.stack([cols[a::2, b::2] for a in range(2) for b in range(2)],
                    axis=0)                                             # (4,Hp,Wp,n_pad,C*9)
    pos = pos.reshape(4, Hp, Wp, n_pad // nb, nb, C * 9)
    pos = jnp.transpose(pos, (3, 0, 1, 2, 4, 5))                        # (T,4,Hp,Wp,nb,C*9)
    return pos.reshape(n_pad // nb, 4 * Hp * Wp * nb, C * 9)


@jax.jit
def convnet_forward(x, prep):
    """Forward pass of the PyTorch ConvNet.  x is NCHW f32 (N, 2, 10, 10);
    prep = prepare_params(params) (already padded bf16/f32 tiles)."""
    N, Cin, H, W = x.shape
    assert (Cin, H, W) == (2, 10, 10), "fc1(16) forces a (2, 10, 10) input"
    nb = min(NB_MAX, _round_up(max(N, 1), SUB))     # padded-batch rows per grid step
    n_pad = _round_up(max(N, 1), nb)
    n_tiles = n_pad // nb

    p1 = _conv1_patches(x, n_pad, nb)                                   # (T, 64*nb, 18)
    p1 = jnp.pad(p1, ((0, 0), (0, 0), (0, LANE - p1.shape[-1]))).astype(jnp.bfloat16)

    weight_args = [prep["w1"], prep["b1"], prep["w2"], prep["b2"],
                   prep["wf1"], prep["bf1"], prep["wf2"], prep["bf2"],
                   prep["wf3"], prep["bf3"]]
    # Weights/biases: constant index_map -> stay VMEM-resident across grid steps.
    weight_specs = [pl.BlockSpec(a.shape, lambda b: (0, 0)) for a in weight_args]

    out = pl.pallas_call(
        functools.partial(convnet_kernel, nb=nb),
        out_shape=jax.ShapeDtypeStruct((n_pad, LANE), jnp.float32),
        grid=(n_tiles,),
        in_specs=[pl.BlockSpec((None, 64 * nb, LANE), lambda b: (b, 0, 0))]
                 + weight_specs,
        out_specs=pl.BlockSpec((nb, LANE), lambda b: (b, 0)),
        compiler_params=pltpu.CompilerParams(
            dimension_semantics=("parallel",),          # 2 TCs on v7x; no-op elsewhere
            vmem_limit_bytes=32 * 1024 * 1024),          # covers v5e's 16 MiB default
    )(p1, *weight_args)
    return out[:N, :OUT_FEATURES]


# ---------------------------------------------------------------------------
# Pure-JAX reference (correctness check only)
# ---------------------------------------------------------------------------
def reference_forward(x, p):
    def conv(x, w, b):
        y = jax.lax.conv_general_dilated(
            x, w, (1, 1), "VALID", dimension_numbers=("NCHW", "OIHW", "NCHW"))
        return y + b.reshape(1, -1, 1, 1)

    def pool(x):
        return jax.lax.reduce_window(x, -jnp.inf, jax.lax.max,
                                     (1, 1, 2, 2), (1, 1, 2, 2), "VALID")

    h = pool(jnp.maximum(conv(x, p["conv1_w"], p["conv1_b"]), 0.0))
    h = pool(jnp.maximum(conv(h, p["conv2_w"], p["conv2_b"]), 0.0))
    h = h.reshape(h.shape[0], -1)
    h = jnp.maximum(h @ p["fc1_w"].T + p["fc1_b"], 0.0)
    h = jnp.maximum(h @ p["fc2_w"].T + p["fc2_b"], 0.0)
    return h @ p["fc3_w"].T + p["fc3_b"]


if __name__ == "__main__":
    key = jax.random.PRNGKey(0)
    ks = jax.random.split(key, 8)

    # Deterministic synthetic parameters (shapes from the module's __init__).
    # TODO(synk): exact xavier_uniform / default conv init not reproduced;
    # values are deterministic Gaussians of comparable scale.
    params = {
        "conv1_w": 0.2 * jax.random.normal(ks[0], (6, 2, 3, 3), jnp.float32),
        "conv1_b": 0.1 * jax.random.normal(ks[1], (6,), jnp.float32),
        "conv2_w": 0.2 * jax.random.normal(ks[2], (16, 6, 3, 3), jnp.float32),
        "conv2_b": 0.1 * jax.random.normal(ks[3], (16,), jnp.float32),
        "fc1_w": 0.2 * jax.random.normal(ks[4], (120, 16), jnp.float32),
        "fc1_b": jnp.zeros((120,), jnp.float32),
        "fc2_w": 0.1 * jax.random.normal(ks[5], (84, 120), jnp.float32),
        "fc2_b": jnp.zeros((84,), jnp.float32),
        "fc3_w": 0.1 * jax.random.normal(ks[6], (6, 84), jnp.float32),
        "fc3_b": jnp.zeros((6,), jnp.float32),
    }

    # batch=2, channels=2, spatial=10x10 (forced by fc1's 16 input features)
    x = jax.random.normal(ks[7], (2, 2, 10, 10), jnp.float32)

    prep = prepare_params(params)          # one-time weight preprocessing
    out = jax.block_until_ready(convnet_forward(x, prep))
    assert out.shape == (2, 6)

    ref = reference_forward(x, params)
    # bf16 MXU operands -> ~1e-2-level relative error; tolerance loosened.
    np.testing.assert_allclose(np.asarray(out), np.asarray(ref),
                               rtol=5e-2, atol=5e-2)
    print("KERNEL_OK")
</pallas_src>

<mosaic_0001>
module attributes {stable_mosaic.version = 11 : i64} {
  func.func @convnet_kernel(%arg0: i32, %arg1: memref<1x512x128xbf16, #tpu.memory_space<vmem>>, %arg2: memref<128x128xbf16, #tpu.memory_space<vmem>>, %arg3: memref<1x128xf32, #tpu.memory_space<vmem>>, %arg4: memref<128x128xbf16, #tpu.memory_space<vmem>>, %arg5: memref<1x128xf32, #tpu.memory_space<vmem>>, %arg6: memref<128x128xbf16, #tpu.memory_space<vmem>>, %arg7: memref<1x128xf32, #tpu.memory_space<vmem>>, %arg8: memref<128x128xbf16, #tpu.memory_space<vmem>>, %arg9: memref<1x128xf32, #tpu.memory_space<vmem>>, %arg10: memref<128x128xbf16, #tpu.memory_space<vmem>>, %arg11: memref<1x128xf32, #tpu.memory_space<vmem>>, %arg12: memref<8x128xf32, #tpu.memory_space<vmem>>) attributes {dimension_semantics = [#tpu.dimension_semantics<parallel>], iteration_bounds = array<i64: 1>, scalar_prefetch = 0 : i64, scratch_operands = 0 : i64, tpu.core_type = #tpu.core_type<tc>, window_params = [{transform_indices = @transform_0, window_bounds = array<i64: 1, 512, 128>}, {pipeline_mode = #tpu.pipeline_mode<synchronous>, transform_indices = @transform_1, window_bounds = array<i64: 128, 128>}, {pipeline_mode = #tpu.pipeline_mode<synchronous>, transform_indices = @transform_2, window_bounds = array<i64: 1, 128>}, {pipeline_mode = #tpu.pipeline_mode<synchronous>, transform_indices = @transform_3, window_bounds = array<i64: 128, 128>}, {pipeline_mode = #tpu.pipeline_mode<synchronous>, transform_indices = @transform_4, window_bounds = array<i64: 1, 128>}, {pipeline_mode = #tpu.pipeline_mode<synchronous>, transform_indices = @transform_5, window_bounds = array<i64: 128, 128>}, {pipeline_mode = #tpu.pipeline_mode<synchronous>, transform_indices = @transform_6, window_bounds = array<i64: 1, 128>}, {pipeline_mode = #tpu.pipeline_mode<synchronous>, transform_indices = @transform_7, window_bounds = array<i64: 128, 128>}, {pipeline_mode = #tpu.pipeline_mode<synchronous>, transform_indices = @transform_8, window_bounds = array<i64: 1, 128>}, {pipeline_mode = #tpu.pipeline_mode<synchronous>, transform_indices = @transform_9, window_bounds = array<i64: 128, 128>}, {pipeline_mode = #tpu.pipeline_mode<synchronous>, transform_indices = @transform_10, window_bounds = array<i64: 1, 128>}, {transform_indices = @transform_11, window_bounds = array<i64: 8, 128>}]} {
    %c0 = arith.constant 0 : index
    %c0_0 = arith.constant 0 : index
    %c0_1 = arith.constant 0 : index
    %0 = vector.load %arg1[%c0, %c0_0, %c0_1] : memref<1x512x128xbf16, #tpu.memory_space<vmem>>, vector<1x512x128xbf16>
    %1 = vector.shape_cast %0 : vector<1x512x128xbf16> to vector<512x128xbf16>
    %c0_2 = arith.constant 0 : index
    %c0_3 = arith.constant 0 : index
    %2 = vector.load %arg2[%c0_2, %c0_3] : memref<128x128xbf16, #tpu.memory_space<vmem>>, vector<128x128xbf16>
    %cst = arith.constant dense<0.000000e+00> : vector<512x128xf32>
    %3 = tpu.matmul %1, %2, %cst {dimension_numbers = #tpu.dot_dimension_numbers<[1], [0], [0], [1], [0, 0, 1, 1], [], []>} : vector<512x128xbf16>, vector<128x128xbf16>, vector<512x128xf32> -> vector<512x128xf32>
    %c0_4 = arith.constant 0 : index
    %c0_5 = arith.constant 0 : index
    %4 = vector.load %arg3[%c0_4, %c0_5] : memref<1x128xf32, #tpu.memory_space<vmem>>, vector<1x128xf32>
    %5 = vector.broadcast %4 : vector<1x128xf32> to vector<512x128xf32>
    %6 = arith.addf %3, %5 : vector<512x128xf32>
    %cst_6 = arith.constant 0.000000e+00 : f32
    %7 = vector.broadcast %cst_6 : f32 to vector<512x128xf32>
    %8 = arith.maximumf %6, %7 : vector<512x128xf32>
    %9 = vector.extract_strided_slice %8 {offsets = [0, 0], sizes = [128, 128], strides = [1, 1]} : vector<512x128xf32> to vector<128x128xf32>
    %10 = vector.extract_strided_slice %8 {offsets = [128, 0], sizes = [128, 128], strides = [1, 1]} : vector<512x128xf32> to vector<128x128xf32>
    %11 = arith.maximumf %9, %10 : vector<128x128xf32>
    %12 = vector.extract_strided_slice %8 {offsets = [256, 0], sizes = [128, 128], strides = [1, 1]} : vector<512x128xf32> to vector<128x128xf32>
    %13 = vector.extract_strided_slice %8 {offsets = [384, 0], sizes = [128, 128], strides = [1, 1]} : vector<512x128xf32> to vector<128x128xf32>
    %14 = arith.maximumf %12, %13 : vector<128x128xf32>
    %15 = arith.maximumf %11, %14 : vector<128x128xf32>
    %16 = vector.extract_strided_slice %15 {offsets = [0, 0], sizes = [16, 128], strides = [1, 1]} : vector<128x128xf32> to vector<16x128xf32>
    %17 = vector.extract_strided_slice %15 {offsets = [32, 0], sizes = [16, 128], strides = [1, 1]} : vector<128x128xf32> to vector<16x128xf32>
    %18 = tpu.concatenate %16, %17 in 0 : vector<16x128xf32>, vector<16x128xf32> -> vector<32x128xf32>
    %19 = vector.extract_strided_slice %15 {offsets = [8, 0], sizes = [16, 128], strides = [1, 1]} : vector<128x128xf32> to vector<16x128xf32>
    %20 = vector.extract_strided_slice %15 {offsets = [40, 0], sizes = [16, 128], strides = [1, 1]} : vector<128x128xf32> to vector<16x128xf32>
    %21 = tpu.concatenate %19, %20 in 0 : vector<16x128xf32>, vector<16x128xf32> -> vector<32x128xf32>
    %c6_i32 = arith.constant 6 : i32
    %22 = tpu.dynamic_rotate %21 by %c6_i32 dim 1 : vector<32x128xf32>, i32 -> vector<32x128xf32>
    %23 = arith.addf %18, %22 : vector<32x128xf32>
    %24 = vector.extract_strided_slice %15 {offsets = [16, 0], sizes = [16, 128], strides = [1, 1]} : vector<128x128xf32> to vector<16x128xf32>
    %25 = vector.extract_strided_slice %15 {offsets = [48, 0], sizes = [16, 128], strides = [1, 1]} : vector<128x128xf32> to vector<16x128xf32>
    %26 = tpu.concatenate %24, %25 in 0 : vector<16x128xf32>, vector<16x128xf32> -> vector<32x128xf32>
    %c12_i32 = arith.constant 12 : i32
    %27 = tpu.dynamic_rotate %26 by %c12_i32 dim 1 : vector<32x128xf32>, i32 -> vector<32x128xf32>
    %28 = arith.addf %23, %27 : vector<32x128xf32>
    %29 = vector.extract_strided_slice %15 {offsets = [32, 0], sizes = [16, 128], strides = [1, 1]} : vector<128x128xf32> to vector<16x128xf32>
    %30 = vector.extract_strided_slice %15 {offsets = [64, 0], sizes = [16, 128], strides = [1, 1]} : vector<128x128xf32> to vector<16x128xf32>
    %31 = tpu.concatenate %29, %30 in 0 : vector<16x128xf32>, vector<16x128xf32> -> vector<32x128xf32>
    %c18_i32 = arith.constant 18 : i32
    %32 = tpu.dynamic_rotate %31 by %c18_i32 dim 1 : vector<32x128xf32>, i32 -> vector<32x128xf32>
    %33 = arith.addf %28, %32 : vector<32x128xf32>
    %34 = vector.extract_strided_slice %15 {offsets = [40, 0], sizes = [16, 128], strides = [1, 1]} : vector<128x128xf32> to vector<16x128xf32>
    %35 = vector.extract_strided_slice %15 {offsets = [72, 0], sizes = [16, 128], strides = [1, 1]} : vector<128x128xf32> to vector<16x128xf32>
    %36 = tpu.concatenate %34, %35 in 0 : vector<16x128xf32>, vector<16x128xf32> -> vector<32x128xf32>
    %c24_i32 = arith.constant 24 : i32
    %37 = tpu.dynamic_rotate %36 by %c24_i32 dim 1 : vector<32x128xf32>, i32 -> vector<32x128xf32>
    %38 = arith.addf %33, %37 : vector<32x128xf32>
    %39 = vector.extract_strided_slice %15 {offsets = [48, 0], sizes = [16, 128], strides = [1, 1]} : vector<128x128xf32> to vector<16x128xf32>
    %40 = vector.extract_strided_slice %15 {offsets = [80, 0], sizes = [16, 128], strides = [1, 1]} : vector<128x128xf32> to vector<16x128xf32>
    %41 = tpu.concatenate %39, %40 in 0 : vector<16x128xf32>, vector<16x128xf32> -> vector<32x128xf32>
    %c30_i32 = arith.constant 30 : i32
    %42 = tpu.dynamic_rotate %41 by %c30_i32 dim 1 : vector<32x128xf32>, i32 -> vector<32x128xf32>
    %43 = arith.addf %38, %42 : vector<32x128xf32>
    %44 = vector.extract_strided_slice %15 {offsets = [64, 0], sizes = [16, 128], strides = [1, 1]} : vector<128x128xf32> to vector<16x128xf32>
    %45 = vector.extract_strided_slice %15 {offsets = [96, 0], sizes = [16, 128], strides = [1, 1]} : vector<128x128xf32> to vector<16x128xf32>
    %46 = tpu.concatenate %44, %45 in 0 : vector<16x128xf32>, vector<16x128xf32> -> vector<32x128xf32>
    %c36_i32 = arith.constant 36 : i32
    %47 = tpu.dynamic_rotate %46 by %c36_i32 dim 1 : vector<32x128xf32>, i32 -> vector<32x128xf32>
    %48 = arith.addf %43, %47 : vector<32x128xf32>
    %49 = vector.extract_strided_slice %15 {offsets = [72, 0], sizes = [16, 128], strides = [1, 1]} : vector<128x128xf32> to vector<16x128xf32>
    %50 = vector.extract_strided_slice %15 {offsets = [104, 0], sizes = [16, 128], strides = [1, 1]} : vector<128x128xf32> to vector<16x128xf32>
    %51 = tpu.concatenate %49, %50 in 0 : vector<16x128xf32>, vector<16x128xf32> -> vector<32x128xf32>
    %c42_i32 = arith.constant 42 : i32
    %52 = tpu.dynamic_rotate %51 by %c42_i32 dim 1 : vector<32x128xf32>, i32 -> vector<32x128xf32>
    %53 = arith.addf %48, %52 : vector<32x128xf32>
    %54 = vector.extract_strided_slice %15 {offsets = [80, 0], sizes = [16, 128], strides = [1, 1]} : vector<128x128xf32> to vector<16x128xf32>
    %55 = vector.extract_strided_slice %15 {offsets = [112, 0], sizes = [16, 128], strides = [1, 1]} : vector<128x128xf32> to vector<16x128xf32>
    %56 = tpu.concatenate %54, %55 in 0 : vector<16x128xf32>, vector<16x128xf32> -> vector<32x128xf32>
    %c48_i32 = arith.constant 48 : i32
    %57 = tpu.dynamic_rotate %56 by %c48_i32 dim 1 : vector<32x128xf32>, i32 -> vector<32x128xf32>
    %58 = arith.addf %53, %57 : vector<32x128xf32>
    %59 = arith.truncf %58 : vector<32x128xf32> to vector<32x128xbf16>
    %c0_7 = arith.constant 0 : index
    %c0_8 = arith.constant 0 : index
    %60 = vector.load %arg4[%c0_7, %c0_8] : memref<128x128xbf16, #tpu.memory_space<vmem>>, vector<128x128xbf16>
    %cst_9 = arith.constant dense<0.000000e+00> : vector<32x128xf32>
    %61 = tpu.matmul %59, %60, %cst_9 {dimension_numbers = #tpu.dot_dimension_numbers<[1], [0], [0], [1], [0, 0, 1, 1], [], []>} : vector<32x128xbf16>, vector<128x128xbf16>, vector<32x128xf32> -> vector<32x128xf32>
    %c0_10 = arith.constant 0 : index
    %c0_11 = arith.constant 0 : index
    %62 = vector.load %arg5[%c0_10, %c0_11] : memref<1x128xf32, #tpu.memory_space<vmem>>, vector<1x128xf32>
    %63 = vector.broadcast %62 : vector<1x128xf32> to vector<32x128xf32>
    %64 = arith.addf %61, %63 : vector<32x128xf32>
    %cst_12 = arith.constant 0.000000e+00 : f32
    %65 = vector.broadcast %cst_12 : f32 to vector<32x128xf32>
    %66 = arith.maximumf %64, %65 : vector<32x128xf32>
    %67 = vector.extract_strided_slice %66 {offsets = [0, 0], sizes = [8, 128], strides = [1, 1]} : vector<32x128xf32> to vector<8x128xf32>
    %68 = vector.extract_strided_slice %66 {offsets = [8, 0], sizes = [8, 128], strides = [1, 1]} : vector<32x128xf32> to vector<8x128xf32>
    %69 = arith.maximumf %67, %68 : vector<8x128xf32>
    %70 = vector.extract_strided_slice %66 {offsets = [16, 0], sizes = [8, 128], strides = [1, 1]} : vector<32x128xf32> to vector<8x128xf32>
    %71 = vector.extract_strided_slice %66 {offsets = [24, 0], sizes = [8, 128], strides = [1, 1]} : vector<32x128xf32> to vector<8x128xf32>
    %72 = arith.maximumf %70, %71 : vector<8x128xf32>
    %73 = arith.maximumf %69, %72 : vector<8x128xf32>
    %74 = arith.truncf %73 : vector<8x128xf32> to vector<8x128xbf16>
    %c0_13 = arith.constant 0 : index
    %c0_14 = arith.constant 0 : index
    %75 = vector.load %arg6[%c0_13, %c0_14] : memref<128x128xbf16, #tpu.memory_space<vmem>>, vector<128x128xbf16>
    %cst_15 = arith.constant dense<0.000000e+00> : vector<8x128xf32>
    %76 = tpu.matmul %74, %75, %cst_15 {dimension_numbers = #tpu.dot_dimension_numbers<[1], [0], [0], [1], [0, 0, 1, 1], [], []>} : vector<8x128xbf16>, vector<128x128xbf16>, vector<8x128xf32> -> vector<8x128xf32>
    %c0_16 = arith.constant 0 : index
    %c0_17 = arith.constant 0 : index
    %77 = vector.load %arg7[%c0_16, %c0_17] : memref<1x128xf32, #tpu.memory_space<vmem>>, vector<1x128xf32>
    %78 = vector.broadcast %77 : vector<1x128xf32> to vector<8x128xf32>
    %79 = arith.addf %76, %78 : vector<8x128xf32>
    %cst_18 = arith.constant 0.000000e+00 : f32
    %80 = vector.broadcast %cst_18 : f32 to vector<8x128xf32>
    %81 = arith.maximumf %79, %80 : vector<8x128xf32>
    %82 = arith.truncf %81 : vector<8x128xf32> to vector<8x128xbf16>
    %c0_19 = arith.constant 0 : index
    %c0_20 = arith.constant 0 : index
    %83 = vector.load %arg8[%c0_19, %c0_20] : memref<128x128xbf16, #tpu.memory_space<vmem>>, vector<128x128xbf16>
    %cst_21 = arith.constant dense<0.000000e+00> : vector<8x128xf32>
    %84 = tpu.matmul %82, %83, %cst_21 {dimension_numbers = #tpu.dot_dimension_numbers<[1], [0], [0], [1], [0, 0, 1, 1], [], []>} : vector<8x128xbf16>, vector<128x128xbf16>, vector<8x128xf32> -> vector<8x128xf32>
    %c0_22 = arith.constant 0 : index
    %c0_23 = arith.constant 0 : index
    %85 = vector.load %arg9[%c0_22, %c0_23] : memref<1x128xf32, #tpu.memory_space<vmem>>, vector<1x128xf32>
    %86 = vector.broadcast %85 : vector<1x128xf32> to vector<8x128xf32>
    %87 = arith.addf %84, %86 : vector<8x128xf32>
    %cst_24 = arith.constant 0.000000e+00 : f32
    %88 = vector.broadcast %cst_24 : f32 to vector<8x128xf32>
    %89 = arith.maximumf %87, %88 : vector<8x128xf32>
    %90 = arith.truncf %89 : vector<8x128xf32> to vector<8x128xbf16>
    %c0_25 = arith.constant 0 : index
    %c0_26 = arith.constant 0 : index
    %91 = vector.load %arg10[%c0_25, %c0_26] : memref<128x128xbf16, #tpu.memory_space<vmem>>, vector<128x128xbf16>
    %cst_27 = arith.constant dense<0.000000e+00> : vector<8x128xf32>
    %92 = tpu.matmul %90, %91, %cst_27 {dimension_numbers = #tpu.dot_dimension_numbers<[1], [0], [0], [1], [0, 0, 1, 1], [], []>} : vector<8x128xbf16>, vector<128x128xbf16>, vector<8x128xf32> -> vector<8x128xf32>
    %c0_28 = arith.constant 0 : index
    %c0_29 = arith.constant 0 : index
    %93 = vector.load %arg11[%c0_28, %c0_29] : memref<1x128xf32, #tpu.memory_space<vmem>>, vector<1x128xf32>
    %94 = vector.broadcast %93 : vector<1x128xf32> to vector<8x128xf32>
    %95 = arith.addf %92, %94 : vector<8x128xf32>
    %c0_30 = arith.constant 0 : index
    %c0_31 = arith.constant 0 : index
    %96 = vector.load %arg12[%c0_30, %c0_31] : memref<8x128xf32, #tpu.memory_space<vmem>>, vector<8x128xf32>
    tpu.vector_store %arg12[%c0_30, %c0_31], %95 {strides = array<i32>} : memref<8x128xf32, #tpu.memory_space<vmem>>, vector<8x128xf32>,
    return
  }
  func.func @transform_0(%arg0: i32) -> (i32, i32, i32) {
    %c0_i32 = arith.constant 0 : i32
    %c0_i32_0 = arith.constant 0 : i32
    %c0_i32_1 = arith.constant 0 : i32
    return %arg0, %c0_i32, %c0_i32_0 : i32, i32, i32
  }
  func.func @transform_1(%arg0: i32) -> (i32, i32) {
    %c0_i32 = arith.constant 0 : i32
    %c0_i32_0 = arith.constant 0 : i32
    %c0_i32_1 = arith.constant 0 : i32
    return %c0_i32, %c0_i32_0 : i32, i32
  }
  func.func @transform_2(%arg0: i32) -> (i32, i32) {
    %c0_i32 = arith.constant 0 : i32
    %c0_i32_0 = arith.constant 0 : i32
    %c0_i32_1 = arith.constant 0 : i32
    return %c0_i32, %c0_i32_0 : i32, i32
  }
  func.func @transform_3(%arg0: i32) -> (i32, i32) {
    %c0_i32 = arith.constant 0 : i32
    %c0_i32_0 = arith.constant 0 : i32
    %c0_i32_1 = arith.constant 0 : i32
    return %c0_i32, %c0_i32_0 : i32, i32
  }
  func.func @transform_4(%arg0: i32) -> (i32, i32) {
    %c0_i32 = arith.constant 0 : i32
    %c0_i32_0 = arith.constant 0 : i32
    %c0_i32_1 = arith.constant 0 : i32
    return %c0_i32, %c0_i32_0 : i32, i32
  }
  func.func @transform_5(%arg0: i32) -> (i32, i32) {
    %c0_i32 = arith.constant 0 : i32
    %c0_i32_0 = arith.constant 0 : i32
    %c0_i32_1 = arith.constant 0 : i32
    return %c0_i32, %c0_i32_0 : i32, i32
  }
  func.func @transform_6(%arg0: i32) -> (i32, i32) {
    %c0_i32 = arith.constant 0 : i32
    %c0_i32_0 = arith.constant 0 : i32
    %c0_i32_1 = arith.constant 0 : i32
    return %c0_i32, %c0_i32_0 : i32, i32
  }
  func.func @transform_7(%arg0: i32) -> (i32, i32) {
    %c0_i32 = arith.constant 0 : i32
    %c0_i32_0 = arith.constant 0 : i32
    %c0_i32_1 = arith.constant 0 : i32
    return %c0_i32, %c0_i32_0 : i32, i32
  }
  func.func @transform_8(%arg0: i32) -> (i32, i32) {
    %c0_i32 = arith.constant 0 : i32
    %c0_i32_0 = arith.constant 0 : i32
    %c0_i32_1 = arith.constant 0 : i32
    return %c0_i32, %c0_i32_0 : i32, i32
  }
  func.func @transform_9(%arg0: i32) -> (i32, i32) {
    %c0_i32 = arith.constant 0 : i32
    %c0_i32_0 = arith.constant 0 : i32
    %c0_i32_1 = arith.constant 0 : i32
    return %c0_i32, %c0_i32_0 : i32, i32
  }
  func.func @transform_10(%arg0: i32) -> (i32, i32) {
    %c0_i32 = arith.constant 0 : i32
    %c0_i32_0 = arith.constant 0 : i32
    %c0_i32_1 = arith.constant 0 : i32
    return %c0_i32, %c0_i32_0 : i32, i32
  }
  func.func @transform_11(%arg0: i32) -> (i32, i32) {
    %c0_i32 = arith.constant 0 : i32
    %c0_i32_0 = arith.constant 0 : i32
    return %arg0, %c0_i32 : i32, i32
  }
}

</mosaic_0001>

<bundles_post_ra>
// kernel: convnet_forward.1
= control target key start
LH: loop header
LB: loop body
LE: loop exit
PB: predicated region body
PF: predicated region fallthrough
CT: control target
= control target key end

     0   :  { %s1487_s20 = smov 24   ;;  %s1489_s21 = smov 30   ;;  %s1990_s1 = inlined_call_operand.vmem [shape: bf16[128,128], index: 1, kind: input, shape index: {}]   ;;  %s1991_s2 = inlined_call_operand.vmem [shape: f32[1,128], index: 2, kind: input, shape index: {}]   ;;  %s1992_s0 = inlined_call_operand.vmem [shape: bf16[1,512,128], index: 0, kind: input, shape index: {}]   ;;  %s1993_s4 = inlined_call_operand.vmem [shape: f32[1,128], index: 4, kind: input, shape index: {}]   ;;  %s1994_s3 = inlined_call_operand.vmem [shape: bf16[128,128], index: 3, kind: input, shape index: {}]   ;;  %s1995_s5 = inlined_call_operand.vmem [shape: bf16[128,128], index: 5, kind: input, shape index: {}]   ;;  %s1996_s6 = inlined_call_operand.vmem [shape: f32[1,128], index: 6, kind: input, shape index: {}]   ;;  %s1997_s7 = inlined_call_operand.vmem [shape: bf16[128,128], index: 7, kind: input, shape index: {}]   ;;  %s1998_s8 = inlined_call_operand.vmem [shape: f32[1,128], index: 8, kind: input, shape index: {}]   ;;  %s1999_s9 = inlined_call_operand.vmem [shape: bf16[128,128], index: 9, kind: input, shape index: {}]   ;;  %s2000_s10 = inlined_call_operand.vmem [shape: f32[1,128], index: 10, kind: input, shape index: {}]   ;;  %s2001_s11 = inlined_call_operand.vmem [shape: f32[8,128], index: 11, kind: output, shape index: {}]  }
   0x1   :  { %v1415_v0 = vld [vmem:[%s1990_s1 + $0x38] sm:$0xff]  ;;  %v1414_v1 = vld [vmem:[%s1990_s1 + $0x30] sm:$0xff]  ;;  %v1413_v2 = vld [vmem:[%s1990_s1 + $0x28] sm:$0xff]  ;;  %s1490_s22 = smov 36   ;;  %s1491_s23 = smov 42  }
   0x2   :  { %362 = vmatpush.bf16.msra.mxu0 %v1415_v0  ;;  %1449 = vmatpush.bf16.msra.mxu2 %v1415_v0  ;;  %v1412_v3 = vld [vmem:[%s1990_s1 + $0x20] sm:$0xff]  ;;  %v1411_v4 = vld [vmem:[%s1990_s1 + $0x18] sm:$0xff]  ;;  %v1410_v5 = vld [vmem:[%s1990_s1 + $0x10] sm:$0xff]  ;;  %s1492_s24 = smov 48  }
   0x3   :  { %1450 = vmatpush.bf16.msra.mxu3 %v1415_v0  ;;  %1448 = vmatpush.bf16.msra.mxu1 %v1415_v0  ;;  %v1409_v6 = vld [vmem:[%s1990_s1 + $0x8] sm:$0xff]  ;;  %v1408_v7 = vld [vmem:[%s1990_s1] sm:$0xff]  ;;  %v1390_v9 = vld [vmem:[%s1992_s0 + $0x70] sm:$0xff]  ;;  %s1488_s1 = smov 12  }
   0x4   :  { %v1376_v8 = vld [vmem:[%s1992_s0] sm:$0xff]  ;;  %v1399_v10 = vld [vmem:[%s1992_s0 + $0xb8] sm:$0xff]  ;;  %v1386_v11 = vld [vmem:[%s1992_s0 + $0x50] sm:$0xff] }
   0x5   :  { %v1377_v12 = vld [vmem:[%s1992_s0 + $0x8] sm:$0xff]  ;;  %v1391_v13 = vld [vmem:[%s1992_s0 + $0x78] sm:$0xff]  ;;  %v1400_v14 = vld [vmem:[%s1992_s0 + $0xc0] sm:$0xff] }
   0x6   :  { %363 = vmatpush.bf16.msra.mxu0 %v1414_v1  ;;  %1452 = vmatpush.bf16.msra.mxu2 %v1414_v1  ;;  %v1387_v15 = vld [vmem:[%s1992_s0 + $0x58] sm:$0xff]  ;;  %v1378_v16 = vld [vmem:[%s1992_s0 + $0x10] sm:$0xff]  ;;  %v1392_v17 = vld [vmem:[%s1992_s0 + $0x80] sm:$0xff] }
   0x7   :  { %1453 = vmatpush.bf16.msra.mxu3 %v1414_v1  ;;  %1451 = vmatpush.bf16.msra.mxu1 %v1414_v1  ;;  %v1401_v18 = vld [vmem:[%s1992_s0 + $0xc8] sm:$0xff]  ;;  %v1388_v19 = vld [vmem:[%s1992_s0 + $0x60] sm:$0xff]  ;;  %v1379_v20 = vld [vmem:[%s1992_s0 + $0x18] sm:$0xff] }
   0x8   :  { %v1393_v21 = vld [vmem:[%s1992_s0 + $0x88] sm:$0xff]  ;;  %v1402_v22 = vld [vmem:[%s1992_s0 + $0xd0] sm:$0xff]  ;;  %v1380_v24 = vld [vmem:[%s1992_s0 + $0x20] sm:$0xff] }
   0x9   :  { %v1389_v23 = vld [vmem:[%s1992_s0 + $0x68] sm:$0xff]  ;;  %v1394_v25 = vld [vmem:[%s1992_s0 + $0x90] sm:$0xff]  ;;  %v1403_v26 = vld [vmem:[%s1992_s0 + $0xd8] sm:$0xff] }
   0xa   :  { %364 = vmatpush.bf16.msra.mxu0 %v1413_v2  ;;  %1455 = vmatpush.bf16.msra.mxu2 %v1413_v2  ;;  %v1381_v27 = vld [vmem:[%s1992_s0 + $0x28] sm:$0xff]  ;;  %v1395_v28 = vld [vmem:[%s1992_s0 + $0x98] sm:$0xff]  ;;  %v1404_v29 = vld [vmem:[%s1992_s0 + $0xe0] sm:$0xff] }
   0xb   :  { %1456 = vmatpush.bf16.msra.mxu3 %v1413_v2  ;;  %1454 = vmatpush.bf16.msra.mxu1 %v1413_v2  ;;  %v1382_v30 = vld [vmem:[%s1992_s0 + $0x30] sm:$0xff]  ;;  %v1396_v31 = vld [vmem:[%s1992_s0 + $0xa0] sm:$0xff]  ;;  %v1405_v32 = vld [vmem:[%s1992_s0 + $0xe8] sm:$0xff] }
   0xc   :  { %v1383_v33 = vld [vmem:[%s1992_s0 + $0x38] sm:$0xff]  ;;  %v1397_v34 = vld [vmem:[%s1992_s0 + $0xa8] sm:$0xff]  ;;  %v1406_v35 = vld [vmem:[%s1992_s0 + $0xf0] sm:$0xff] }
   0xd   :  { %v1384_v36 = vld [vmem:[%s1992_s0 + $0x40] sm:$0xff]  ;;  %v1398_v37 = vld [vmem:[%s1992_s0 + $0xb0] sm:$0xff]  ;;  %v1407_v39 = vld [vmem:[%s1992_s0 + $0xf8] sm:$0xff] }
   0xe   :  { %365 = vmatpush.bf16.msra.mxu0 %v1412_v3  ;;  %1458 = vmatpush.bf16.msra.mxu2 %v1412_v3  ;;  %v1385_v45 = vld [vmem:[%s1992_s0 + $0x48] sm:$0xff]  ;;  %v1696_v53 = vld [vmem:[%s1991_s2] ss:$0 sm:$0xff]  ;;  %s1485_s0 = smov 18   ;;  %s1486_s2 = smov 6  }
   0xf   :  { %1459 = vmatpush.bf16.msra.mxu3 %v1412_v3  ;;  %1457 = vmatpush.bf16.msra.mxu1 %v1412_v3 }
  0x12   :  { %366 = vmatpush.bf16.msra.mxu0 %v1411_v4  ;;  %1461 = vmatpush.bf16.msra.mxu2 %v1411_v4 }
  0x13   :  { %1462 = vmatpush.bf16.msra.mxu3 %v1411_v4  ;;  %1460 = vmatpush.bf16.msra.mxu1 %v1411_v4 }
  0x16   :  { %367 = vmatpush.bf16.msra.mxu0 %v1410_v5  ;;  %1464 = vmatpush.bf16.msra.mxu2 %v1410_v5 }
  0x17   :  { %1465 = vmatpush.bf16.msra.mxu3 %v1410_v5  ;;  %1463 = vmatpush.bf16.msra.mxu1 %v1410_v5 }
  0x1a   :  { %368 = vmatpush.bf16.msra.mxu0 %v1409_v6  ;;  %1467 = vmatpush.bf16.msra.mxu2 %v1409_v6 }
  0x1b   :  { %1468 = vmatpush.bf16.msra.mxu3 %v1409_v6  ;;  %1466 = vmatpush.bf16.msra.mxu1 %v1409_v6 }
  0x1e   :  { %369 = vmatpush.bf16.msra.mxu0 %v1408_v7  ;;  %1470 = vmatpush.bf16.msra.mxu2 %v1408_v7 }
  0x1f   :  { %1471 = vmatpush.bf16.msra.mxu3 %v1408_v7  ;;  %1469 = vmatpush.bf16.msra.mxu1 %v1408_v7 }
  0x21   :  { %370 = vmatmul.bf16.vlgmr.msra.gmra.mxu0 %v1376_v8  ;;  %440 = vmatmul.bf16.vlgmr.msra.gmra.mxu2 %v1390_v9 }
  0x22   :  { %485 = vmatmul.bf16.vlgmr.msra.gmra.mxu3 %v1399_v10  ;;  %420 = vmatmul.bf16.vlgmr.msra.gmra.mxu1 %v1386_v11 }
  0x31   :  { %375 = vmatmul.bf16.gmra.mxu0 %v1377_v12  ;;  %445 = vmatmul.bf16.gmra.mxu2 %v1391_v13 }
  0x32   :  { %490 = vmatmul.bf16.gmra.mxu3 %v1400_v14  ;;  %425 = vmatmul.bf16.gmra.mxu1 %v1387_v15 }
  0x41   :  { %380 = vmatmul.bf16.gmra.mxu0 %v1378_v16  ;;  %450 = vmatmul.bf16.gmra.mxu2 %v1392_v17 }
  0x42   :  { %495 = vmatmul.bf16.gmra.mxu3 %v1401_v18  ;;  %430 = vmatmul.bf16.gmra.mxu1 %v1388_v19 }
  0x51   :  { %385 = vmatmul.bf16.gmra.mxu0 %v1379_v20  ;;  %455 = vmatmul.bf16.gmra.mxu2 %v1393_v21 }
  0x52   :  { %500 = vmatmul.bf16.gmra.mxu3 %v1402_v22  ;;  %435 = vmatmul.bf16.gmra.mxu1 %v1389_v23 }
  0x61   :  { %390 = vmatmul.bf16.gmra.mxu0 %v1380_v24  ;;  %460 = vmatmul.bf16.gmra.mxu2 %v1394_v25 }
  0x62   :  { %505 = vmatmul.bf16.gmra.mxu3 %v1403_v26 }
  0x71   :  { %395 = vmatmul.bf16.gmra.mxu0 %v1381_v27  ;;  %465 = vmatmul.bf16.gmra.mxu2 %v1395_v28 }
  0x72   :  { %510 = vmatmul.bf16.gmra.mxu3 %v1404_v29 }
  0x81   :  { %400 = vmatmul.bf16.gmra.mxu0 %v1382_v30  ;;  %470 = vmatmul.bf16.gmra.mxu2 %v1396_v31 }
  0x82   :  { %515 = vmatmul.bf16.gmra.mxu3 %v1405_v32 }
  0x91   :  { %405 = vmatmul.bf16.gmra.mxu0 %v1383_v33  ;;  %475 = vmatmul.bf16.gmra.mxu2 %v1397_v34 }
  0x92   :  { %520 = vmatmul.bf16.gmra.mxu3 %v1406_v35 }
  0x9e   :  { %v1667_v38 = vpop.f32.mrf.mxu0 }
  0x9f   :  { %v421_v4 = vpop.f32.mrf.mxu1 }
  0xa0   :  { %v422_v24 = vadd.f32 %v1696_v53, %v421_v4 }
  0xa1   :  { %410 = vmatmul.bf16.gmra.mxu0 %v1384_v36  ;;  %480 = vmatmul.bf16.gmra.mxu2 %v1398_v37 }
  0xa2   :  { %525 = vmatmul.bf16.gmra.mxu3 %v1407_v39  ;;  %v551_v30 = vmax.f32 %v422_v24, 0.0 }
  0xa4   :  { %v1672_v40 = vpop.f32.mrf.mxu2 }
  0xa5   :  { %v1674_v41 = vpop.f32.mrf.mxu3 }
  0xa6   :  { %v1676_v42 = vpop.f32.mrf.mxu0 }
  0xa7   :  { %v423_v14 = vpop.f32.mrf.mxu1 }
  0xa8   :  { %v424_v36 = vadd.f32 %v1696_v53, %v423_v14 }
  0xac   :  { %v1678_v43 = vpop.f32.mrf.mxu2 }
  0xad   :  { %v1680_v44 = vpop.f32.mrf.mxu3 }
  0xae   :  { %v1685_v46 = vpop.f32.mrf.mxu0 }
  0xaf   :  { %v426_v27 = vpop.f32.mrf.mxu1 }
  0xb1   :  { %415 = vmatmul.bf16.gmra.mxu0 %v1385_v45 }
  0xb4   :  { %v1687_v47 = vpop.f32.mrf.mxu2 }
  0xb5   :  { %v491_v48 = vpop.f32.mrf.mxu3 }
  0xb6   :  { %v1689_v49 = vpop.f32.mrf.mxu0  ;;  %v492_v54 = vadd.f32 %v1696_v53, %v491_v48 }
  0xb8   :  { %v579_v56 = vmax.f32 %v492_v54, 0.0 }
  0xbc   :  { %v1691_v50 = vpop.f32.mrf.mxu2 }
  0xbd   :  { %v493_v51 = vpop.f32.mrf.mxu3 }
  0xbe   :  { %v381_v52 = vpop.f32.mrf.mxu0  ;;  %v494_v61 = vadd.f32 %v1696_v53, %v493_v51 }
  0xbf   :  { %v382_v23 = vadd.f32 %v1696_v53, %v381_v52 }
  0xc0   :  { %v580_v0 = vmax.f32 %v494_v61, 0.0 }
  0xc1   :  { %v535_v29 = vmax.f32 %v382_v23, 0.0 }
  0xc3   :  { %v599_v37 = vmax.f32 %v535_v29, %v551_v30 }
  0xc4   :  { %v451_v55 = vpop.f32.mrf.mxu2 }
  0xc5   :  { %v452_v57 = vadd.f32 %v1696_v53, %v451_v55  ;;  %v496_v58 = vpop.f32.mrf.mxu3  ;;  %v552_v55 = vmax.f32 %v424_v36, 0.0 }
  0xc6   :  { %v383_v59 = vpop.f32.mrf.mxu0  ;;  %v497_v6 = vadd.f32 %v1696_v53, %v496_v58 }
  0xc7   :  { %v563_v60 = vmax.f32 %v452_v57, 0.0  ;;  %v384_v39 = vadd.f32 %v1696_v53, %v383_v59 }
  0xc8   :  { %v581_v9 = vmax.f32 %v497_v6, 0.0 }
  0xc9   :  { %v1701_v62 = vmax.f32 %v563_v60, %v579_v56  ;;  %v536_v54 = vmax.f32 %v384_v39, 0.0  ;;  %v428_v56 = vpop.f32.mrf.mxu1 }
  0xcc   :  { %v453_v63 = vpop.f32.mrf.mxu2 }
  0xcd   :  { %v454_v1 = vadd.f32 %v1696_v53, %v453_v63  ;;  %v498_v2 = vpop.f32.mrf.mxu3  ;;  %v427_v63 = vadd.f32 %v1696_v53, %v426_v27 }
  0xce   :  { %v386_v3 = vpop.f32.mrf.mxu0  ;;  %v499_v15 = vadd.f32 %v1696_v53, %v498_v2 }
  0xcf   :  { %v564_v5 = vmax.f32 %v454_v1, 0.0  ;;  %v387_v1 = vadd.f32 %v1696_v53, %v386_v3 }
  0xd0   :  { %v582_v18 = vmax.f32 %v499_v15, 0.0 }
  0xd1   :  { %v1705_v7 = vmax.f32 %v564_v5, %v580_v0  ;;  %v600_v0 = vmax.f32 %v536_v54, %v552_v55  ;;  %v431_v14 = vpop.f32.mrf.mxu1 }
  0xd4   :  { %v456_v8 = vpop.f32.mrf.mxu2 }
  0xd5   :  { %v457_v10 = vadd.f32 %v1696_v53, %v456_v8  ;;  %v501_v11 = vpop.f32.mrf.mxu3  ;;  %v537_v8 = vmax.f32 %v387_v1, 0.0 }
  0xd6   :  { %v1708_v12 = vpop.f32.mrf.mxu0  ;;  %v502_v25 = vadd.f32 %v1696_v53, %v501_v11 }
  0xd7   :  { %v565_v13 = vmax.f32 %v457_v10, 0.0 }
  0xd8   :  { %v583_v31 = vmax.f32 %v502_v25, 0.0 }
  0xd9   :  { %v1711_v16 = vmax.f32 %v565_v13, %v581_v9  ;;  %v553_v9 = vmax.f32 %v427_v63, 0.0  ;;  %v433_v36 = vpop.f32.mrf.mxu1 }
  0xdc   :  { %v458_v17 = vpop.f32.mrf.mxu2 }
  0xdd   :  { %v459_v19 = vadd.f32 %v1696_v53, %v458_v17  ;;  %v503_v20 = vpop.f32.mrf.mxu3  ;;  %v429_v17 = vadd.f32 %v1696_v53, %v428_v56 }
  0xde   :  { %v1714_v21 = vpop.f32.mrf.mxu0  ;;  %v504_v45 = vadd.f32 %v1696_v53, %v503_v20 }
  0xdf   :  { %v566_v22 = vmax.f32 %v459_v19, 0.0  ;;  %v389_v19 = vadd.f32 %v1696_v53, %v1708_v12  ;;  %v554_v27 = vmax.f32 %v429_v17, 0.0 }
  0xe0   :  { %v584_v57 = vmax.f32 %v504_v45, 0.0 }
  0xe1   :  { %v1719_v26 = vmax.f32 %v566_v22, %v582_v18  ;;  %v601_v18 = vmax.f32 %v537_v8, %v553_v9  ;;  %v538_v25 = vmax.f32 %v389_v19, 0.0  ;;  %v436_v8 = vpop.f32.mrf.mxu1 }
  0xe4   :  { %v461_v28 = vpop.f32.mrf.mxu2 }
  0xe5   :  { %v462_v32 = vadd.f32 %v1696_v53, %v461_v28  ;;  %v506_v33 = vpop.f32.mrf.mxu3 }
  0xe6   :  { %v1722_v34 = vpop.f32.mrf.mxu0  ;;  %v507_v2 = vadd.f32 %v1696_v53, %v506_v33  ;;  %v432_v33 = vadd.f32 %v1696_v53, %v431_v14 }
  0xe7   :  { %v567_v35 = vmax.f32 %v462_v32, 0.0  ;;  %v392_v32 = vadd.f32 %v1696_v53, %v1714_v21  ;;  %v394_v1 = vadd.f32 %v1696_v53, %v1722_v34 }
  0xe8   :  { %v585_v10 = vmax.f32 %v507_v2, 0.0  ;;  %v555_v54 = vmax.f32 %v432_v33, 0.0 }
  0xe9   :  { %v615_v48 = vmax.f32 %v567_v35, %v583_v31  ;;  %v602_v35 = vmax.f32 %v538_v25, %v554_v27 }
  0xeb   :  { %v1727_v51 = vmax.f32 %v599_v37, %v615_v48  ;;  %v444_v48 = vadd.f32 %v1696_v53, %v1678_v43  ;;  %v434_v43 = vadd.f32 %v1696_v53, %v433_v36 }
  0xec   :  { %v463_v52 = vpop.f32.mrf.mxu2 }
  0xed   :  { %v464_v58 = vadd.f32 %v1696_v53, %v463_v52  ;;  %v508_v60 = vpop.f32.mrf.mxu3  ;;  %667 = vrot.lane.b32.xlu2 %v1727_v51, %s1485_s0  ;;  %v539_v52 = vmax.f32 %v392_v32, 0.0  ;;  %v560_v63 = vmax.f32 %v444_v48, 0.0  ;;  %v556_v14 = vmax.f32 %v434_v43, 0.0  ;;  %v438_v32 = vpop.f32.mrf.mxu1 }
  0xee   :  { %v1732_v61 = vpop.f32.mrf.mxu0  ;;  %v509_v20 = vadd.f32 %v1696_v53, %v508_v60  ;;  %v439_v48 = vadd.f32 %v1696_v53, %v438_v32 }
  0xef   :  { %v568_v59 = vmax.f32 %v464_v58, 0.0 }
  0xf0   :  { %v586_v28 = vmax.f32 %v509_v20, 0.0  ;;  %v437_v20 = vadd.f32 %v1696_v53, %v436_v8 }
  0xf1   :  { %v616_v4 = vmax.f32 %v568_v59, %v584_v57 }
  0xf3   :  { %v1737_v5 = vmax.f32 %v600_v0, %v616_v4  ;;  %v603_v0 = vmax.f32 %v539_v52, %v555_v54 }
  0xf4   :  { %v466_v6 = vpop.f32.mrf.mxu2 }
  0xf5   :  { %v467_v11 = vadd.f32 %v1696_v53, %v466_v6  ;;  %v511_v13 = vpop.f32.mrf.mxu3  ;;  %647 = vrot.lane.b32.xlu1 %v1737_v5, %s1486_s2  ;;  %679 = vrot.lane.b32.xlu0 %v1737_v5, %s1487_s20 }
  0xf6   :  { %669 = vrot.lane.b32.xlu2 %v1737_v5, %s1485_s0  ;;  %v1746_v3 = vpop.f32.mrf.mxu0  ;;  %v512_v37 = vadd.f32 %v1696_v53, %v511_v13  ;;  %v540_v13 = vmax.f32 %v394_v1, 0.0 }
  0xf7   :  { %v569_v15 = vmax.f32 %v467_v11, 0.0 }
  0xf8   :  { %v587_v56 = vmax.f32 %v512_v37, 0.0 }
  0xf9   :  { %v617_v22 = vmax.f32 %v569_v15, %v585_v10 }
  0xfb   :  { %v633_v23 = vmax.f32 %v601_v18, %v617_v22  ;;  %v604_v22 = vmax.f32 %v540_v13, %v556_v14 }
  0xfc   :  { %v468_v24 = vpop.f32.mrf.mxu2 }
  0xfd   :  { %v469_v29 = vadd.f32 %v1696_v53, %v468_v24  ;;  %v513_v30 = vpop.f32.mrf.mxu3  ;;  %681 = vrot.lane.b32.xlu1 %v633_v23, %s1487_s20  ;;  %659 = vrot.lane.b32.xlu0 %v633_v23, %s1488_s1 }
  0xfe   :  { %691 = vrot.lane.b32.xlu2 %v633_v23, %s1489_s21  ;;  %v1756_v12 = vpop.f32.mrf.mxu0  ;;  %v514_v2 = vadd.f32 %v1696_v53, %v513_v30 }
  0xff   :  { %v570_v31 = vmax.f32 %v469_v29, 0.0  ;;  %v402_v8 = vadd.f32 %v1696_v53, %v1756_v12  ;;  %v447_v12 = vadd.f32 %v1696_v53, %v1687_v47 }
 0x100   :  { %v588_v15 = vmax.f32 %v514_v2, 0.0 }
 0x101   :  { %v618_v39 = vmax.f32 %v570_v31, %v586_v28  ;;  %v449_v28 = vadd.f32 %v1696_v53, %v1691_v50  ;;  %v557_v31 = vmax.f32 %v437_v20, 0.0  ;;  %v374_v20 = vadd.f32 %v1696_v53, %v1676_v42 }
 0x102   :  { %v561_v32 = vmax.f32 %v447_v12, 0.0 }
 0x103   :  { %v634_v45 = vmax.f32 %v602_v35, %v618_v39  ;;  %v562_v50 = vmax.f32 %v449_v28, 0.0 }
 0x104   :  { %v471_v55 = vpop.f32.mrf.mxu2 }
 0x105   :  { %v472_v57 = vadd.f32 %v1696_v53, %v471_v55  ;;  %v516_v58 = vpop.f32.mrf.mxu3  ;;  %661 = vrot.lane.b32.xlu1 %v634_v45, %s1488_s1  ;;  %693 = vrot.lane.b32.xlu0 %v634_v45, %s1489_s21  ;;  %v399_v45 = vadd.f32 %v1696_v53, %v1746_v3 }
 0x106   :  { %649 = vrot.lane.b32.xlu2 %v633_v23, %s1486_s2  ;;  %v403_v21 = vpop.f32.mrf.mxu0  ;;  %v397_v23 = vadd.f32 %v1696_v53, %v1732_v61  ;;  %v517_v24 = vadd.f32 %v1696_v53, %v516_v58 }
 0x107   :  { %v571_v60 = vmax.f32 %v472_v57, 0.0  ;;  %v404_v59 = vadd.f32 %v1696_v53, %v403_v21  ;;  %v372_v21 = vadd.f32 %v1696_v53, %v1667_v38 }
 0x108   :  { %v541_v30 = vmax.f32 %v397_v23, 0.0  ;;  %v589_v33 = vmax.f32 %v517_v24, 0.0  ;;  %v543_v23 = vmax.f32 %v402_v8, 0.0 }
 0x109   :  { %v619_v4 = vmax.f32 %v571_v60, %v587_v56  ;;  %v544_v6 = vmax.f32 %v404_v59, 0.0  ;;  %v542_v60 = vmax.f32 %v399_v45, 0.0  ;;  %v558_v59 = vmax.f32 %v439_v48, 0.0 }
 0x10a   :  { %v605_v52 = vmax.f32 %v541_v30, %v557_v31  ;;  %v531_v38 = vmax.f32 %v372_v21, 0.0 }
 0x10b   :  { %v1773_v9 = vmax.f32 %v544_v6, %v560_v63  ;;  %v635_v10 = vmax.f32 %v603_v0, %v619_v4  ;;  %v606_v6 = vmax.f32 %v542_v60, %v558_v59 }
 0x10c   :  { %v473_v11 = vpop.f32.mrf.mxu2 }
 0x10d   :  { %v474_v17 = vadd.f32 %v1696_v53, %v473_v11  ;;  %v518_v18 = vpop.f32.mrf.mxu3  ;;  %703 = vrot.lane.b32.xlu1 %v635_v10, %s1490_s22 }
 0x10e   :  { %671 = vrot.lane.b32.xlu2 %v635_v10, %s1485_s0  ;;  %v406_v34 = vpop.f32.mrf.mxu0  ;;  %v519_v54 = vadd.f32 %v1696_v53, %v518_v18 }
 0x10f   :  { %v572_v19 = vmax.f32 %v474_v17, 0.0  ;;  %v407_v14 = vadd.f32 %v1696_v53, %v406_v34 }
 0x110   :  { %v590_v0 = vmax.f32 %v519_v54, 0.0 }
 0x111   :  { %v620_v25 = vmax.f32 %v572_v19, %v588_v15  ;;  %v442_v15 = vadd.f32 %v1696_v53, %v1672_v40  ;;  %v487_v19 = vadd.f32 %v1696_v53, %v1674_v41  ;;  %v545_v28 = vmax.f32 %v407_v14, 0.0 }
 0x113   :  { %v1782_v27 = vmax.f32 %v604_v22, %v620_v25  ;;  %v559_v47 = vmax.f32 %v442_v15, 0.0  ;;  %v577_v31 = vmax.f32 %v487_v19, 0.0 }
 0x114   :  { %v476_v29 = vpop.f32.mrf.mxu2 }
 0x115   :  { %v477_v35 = vadd.f32 %v1696_v53, %v476_v29  ;;  %v521_v36 = vpop.f32.mrf.mxu3  ;;  %715 = vrot.lane.b32.xlu0 %v1782_v27, %s1491_s23 }
 0x116   :  { %705 = vrot.lane.b32.xlu2 %v1782_v27, %s1490_s22  ;;  %v408_v61 = vpop.f32.mrf.mxu0  ;;  %v522_v10 = vadd.f32 %v1696_v53, %v521_v36  ;;  %v607_v36 = vmax.f32 %v543_v23, %v559_v47  ;;  %v1418_v47 = vld [vmem:[%s1994_s3 + $0x10] sm:$0xff] }
 0x117   :  { %v573_v37 = vmax.f32 %v477_v35, 0.0  ;;  %v409_v39 = vadd.f32 %v1696_v53, %v408_v61  ;;  %v532_v35 = vmax.f32 %v374_v20, 0.0 }
 0x118   :  { %v591_v24 = vmax.f32 %v522_v10, 0.0 }
 0x119   :  { %v621_v55 = vmax.f32 %v573_v37, %v589_v33  ;;  %v546_v56 = vmax.f32 %v409_v39, 0.0  ;;  %v609_v39 = vmax.f32 %v545_v28, %v561_v32  ;;  %v1417_v32 = vld [vmem:[%s1994_s3 + $0x8] sm:$0xff] }
 0x11b   :  { %v1796_v57 = vmax.f32 %v605_v52, %v621_v55  ;;  %v1798_v58 = vmax.f32 %v546_v56, %v562_v50  ;;  %v489_v52 = vadd.f32 %v1696_v53, %v1680_v44  ;;  %v377_v55 = vadd.f32 %v1696_v53, %v1685_v46 }
 0x11c   :  { %v478_v63 = vpop.f32.mrf.mxu2 }
 0x11d   :  { %v479_v3 = vadd.f32 %v1696_v53, %v478_v63  ;;  %v1803_v43 = vpop.f32.mrf.mxu3  ;;  %717 = vrot.lane.b32.xlu1 %v1796_v57, %s1491_s23 }
 0x11e   :  { %727 = vrot.lane.b32.xlu2 %v1796_v57, %s1492_s24  ;;  %v411_v1 = vpop.f32.mrf.mxu0 }
 0x11f   :  { %v574_v2 = vmax.f32 %v479_v3, 0.0  ;;  %v412_v4 = vadd.f32 %v1696_v53, %v411_v1  ;;  %v533_v3 = vmax.f32 %v377_v55, 0.0 }
 0x121   :  { %v622_v11 = vmax.f32 %v574_v2, %v590_v0  ;;  %v547_v13 = vmax.f32 %v412_v4, 0.0  ;;  %v578_v0 = vmax.f32 %v489_v52, 0.0 }
 0x123   :  { %v1816_v17 = vmax.f32 %v531_v38, %v547_v13  ;;  %v1818_v18 = vmax.f32 %v606_v6, %v622_v11 }
 0x124   :  { %v481_v22 = vpop.f32.mrf.mxu2 }
 0x125   :  { %v482_v34 = vadd.f32 %v1696_v53, %v481_v22  ;;  %v526_v25 = vpop.f32.mrf.mxu3  ;;  %729 = vrot.lane.b32.xlu0 %v1818_v18, %s1492_s24  ;;  %v627_v40 = vmax.f32 %v1816_v17, %v1701_v62  ;;  %v1431_v62 = vld [vmem:[%s1995_s5 + $0x38] sm:$0xff] }
 0x126   :  { %v527_v41 = vadd.f32 %v1696_v53, %v526_v25  ;;  %685 = vrot.lane.b32.xlu2 %v1796_v57, %s1487_s20  ;;  %v413_v42 = vpop.f32.mrf.mxu0  ;;  %904 = vmatpush.bf16.msrb.mxu2 %v1431_v62 }
 0x127   :  { %v575_v29 = vmax.f32 %v482_v34, 0.0  ;;  %v414_v30 = vadd.f32 %v1696_v53, %v413_v42 }
 0x128   :  { %v593_v33 = vmax.f32 %v527_v41, 0.0 }
 0x129   :  { %v623_v61 = vmax.f32 %v575_v29, %v591_v24  ;;  %v548_v37 = vmax.f32 %v414_v30, 0.0  ;;  %v1419_v24 = vld [vmem:[%s1994_s3 + $0x18] sm:$0xff] }
 0x12a   :  { %v625_v50 = vmax.f32 %v577_v31, %v593_v33  ;;  %v1416_v33 = vld [vmem:[%s1994_s3] sm:$0xff] }
 0x12b   :  { %v596_v45 = vmax.f32 %v532_v35, %v548_v37  ;;  %v639_v48 = vmax.f32 %v607_v36, %v623_v61 }
 0x12c   :  { %v641_v54 = vmax.f32 %v609_v39, %v625_v50 }
 0x12d   :  { %v528_v56 = vpop.f32.mrf.mxu3  ;;  %v1840_v21 = vmax.f32 %v596_v45, %v1705_v7  ;;  %v379_v7 = vadd.f32 %v1696_v53, %v1689_v49  ;;  %v524_v49 = vadd.f32 %v1696_v53, %v1803_v43 }
 0x12e   :  { %v529_v60 = vadd.f32 %v1696_v53, %v528_v56  ;;  %707 = vrot.lane.b32.xlu2 %v639_v48, %s1490_s22  ;;  %v416_v59 = vpop.f32.mrf.mxu0 }
 0x12f   :  { %v417_v63 = vadd.f32 %v1696_v53, %v416_v59  ;;  %643 = vrot.lane.b32.xlu0 %v1840_v21, %s1486_s2  ;;  %v534_v10 = vmax.f32 %v379_v7, 0.0  ;;  %v592_v15 = vmax.f32 %v524_v49, 0.0 }
 0x130   :  { %v594_v44 = vmax.f32 %v529_v60, 0.0 }
 0x131   :  { %v549_v1 = vmax.f32 %v417_v63, 0.0 }
 0x132   :  { %v626_v2 = vmax.f32 %v578_v0, %v594_v44 }
 0x133   :  { %v597_v46 = vmax.f32 %v533_v3, %v549_v1 }
 0x134   :  { %v642_v4 = vmax.f32 %v1798_v58, %v626_v2  ;;  %v483_v58 = vpop.f32.mrf.mxu2 }
 0x135   :  { %v629_v38 = vmax.f32 %v597_v46, %v1711_v16  ;;  %v484_v16 = vadd.f32 %v1696_v53, %v483_v58 }
 0x136   :  { %721 = vrot.lane.b32.xlu2 %v641_v54, %s1491_s23  ;;  %v418_v6 = vpop.f32.mrf.mxu0 }
 0x137   :  { %v419_v8 = vadd.f32 %v1696_v53, %v418_v6  ;;  %655 = vrot.lane.b32.xlu1 %v629_v38, %s1488_s1  ;;  %645 = vrot.lane.b32.xlu0 %v629_v38, %s1486_s2  ;;  %v576_v19 = vmax.f32 %v484_v16, 0.0  ;;  %v1423_v53 = vld [vmem:[%s1994_s3 + $0x38] sm:$0xff]  ;;  %v1429_v6 = vld [vmem:[%s1995_s5 + $0x28] sm:$0xff] }
 0x138   :  { %809 = vmatpush.bf16.msrb.mxu1 %v1423_v53  ;;  %v1428_v16 = vld [vmem:[%s1995_s5 + $0x20] sm:$0xff] }
 0x139   :  { %v550_v11 = vmax.f32 %v419_v8, 0.0 }
 0x13b   :  { %v598_v13 = vmax.f32 %v534_v10, %v550_v11 }
 0x13d   :  { %v630_v14 = vmax.f32 %v598_v13, %v1719_v26  ;;  %v624_v26 = vmax.f32 %v576_v19, %v592_v15 }
 0x13f   :  { %657 = vrot.lane.b32.xlu1 %v630_v14, %s1488_s1  ;;  %673 = vrot.lane.b32.xlu0 %v1782_v27, %s1485_s0  ;;  %v640_v20 = vmax.f32 %v1773_v9, %v624_v26  ;;  %v1422_v9 = vld [vmem:[%s1994_s3 + $0x30] sm:$0xff] }
 0x140   :  { %810 = vmatpush.bf16.msrb.mxu1 %v1422_v9 }
 0x147   :  { %683 = vrot.lane.b32.xlu1 %v1782_v27, %s1487_s20  ;;  %695 = vrot.lane.b32.xlu0 %v1796_v57, %s1489_s21  ;;  %v1421_v27 = vld [vmem:[%s1994_s3 + $0x28] sm:$0xff]  ;;  %v668_v57 = vpop.permute.xlu2 %667 }
 0x148   :  { %811 = vmatpush.bf16.msrb.mxu1 %v1421_v27 }
 0x14f   :  { %697 = vrot.lane.b32.xlu1 %v1818_v18, %s1489_s21  ;;  %709 = vrot.lane.b32.xlu0 %v640_v20, %s1490_s22  ;;  %v1420_v18 = vld [vmem:[%s1994_s3 + $0x20] sm:$0xff] }
 0x150   :  { %812 = vmatpush.bf16.msrb.mxu1 %v1420_v18  ;;  %v670_v22 = vpop.permute.xlu2 %669 }
 0x154   :  { %813 = vmatpush.bf16.msrb.mxu1 %v1419_v24 }
 0x157   :  { %719 = vrot.lane.b32.xlu1 %v640_v20, %s1491_s23  ;;  %731 = vrot.lane.b32.xlu0 %v641_v54, %s1492_s24 }
 0x158   :  { %v692_v25 = vpop.permute.xlu2 %691  ;;  %814 = vmatpush.bf16.msrb.mxu1 %v1418_v47 }
 0x15c   :  { %815 = vmatpush.bf16.msrb.mxu1 %v1417_v32 }
 0x15f   :  { %733 = vrot.lane.b32.xlu1 %v642_v4, %s1492_s24 }
 0x160   :  { %v650_v29 = vpop.permute.xlu2 %649  ;;  %816 = vmatpush.bf16.msrb.mxu1 %v1416_v33  ;;  %v1438_v33 = vld [vmem:[%s1997_s7 + $0x30] sm:$0xff] }
 0x161   :  { %v654_v10 = vadd.f32 %v650_v29, %v1737_v5  ;;  %v1427_v5 = vld [vmem:[%s1995_s5 + $0x18] sm:$0xff]  ;;  %v1425_v29 = vld [vmem:[%s1995_s5 + $0x8] sm:$0xff] }
 0x167   :  { %v680_v43 = vpop.permute.xlu0 %679  ;;  %v648_v12 = vpop.permute.xlu1 %647 }
 0x168   :  { %v672_v35 = vpop.permute.xlu2 %671  ;;  %v653_v7 = vadd.f32 %v648_v12, %v1727_v51 }
 0x16f   :  { %v660_v23 = vpop.permute.xlu0 %659  ;;  %v682_v34 = vpop.permute.xlu1 %681 }
 0x170   :  { %v706_v37 = vpop.permute.xlu2 %705  ;;  %v665_v11 = vadd.f32 %v660_v23, %v653_v7  ;;  %v1443_v7 = vld [vmem:[%s1999_s9 + $0x18] sm:$0xff] }
 0x172   :  { %v677_v19 = vadd.f32 %v672_v35, %v665_v11  ;;  %v1437_v35 = vld [vmem:[%s1997_s7 + $0x28] sm:$0xff] }
 0x177   :  { %v694_v28 = vpop.permute.xlu0 %693  ;;  %v662_v41 = vpop.permute.xlu1 %661 }
 0x178   :  { %v728_v56 = vpop.permute.xlu2 %727  ;;  %v666_v58 = vadd.f32 %v662_v41, %v654_v10 }
 0x17f   :  { %v704_v30 = vpop.permute.xlu1 %703 }
 0x180   :  { %v686_v4 = vpop.permute.xlu2 %685 }
 0x187   :  { %v716_v42 = vpop.permute.xlu0 %715 }
 0x188   :  { %v708_v20 = vpop.permute.xlu2 %707 }
 0x18f   :  { %v718_v36 = vpop.permute.xlu1 %717 }
 0x190   :  { %v722_v24 = vpop.permute.xlu2 %721 }
 0x197   :  { %v730_v31 = vpop.permute.xlu0 %729 }
 0x1a1   :  { %v644_v61 = vpop.permute.xlu0 %643 }
 0x1a2   :  { %v651_v39 = vadd.f32 %v644_v61, %v627_v40  ;;  %v1430_v40 = vld [vmem:[%s1995_s5 + $0x30] sm:$0xff]  ;;  %v1436_v61 = vld [vmem:[%s1997_s7 + $0x20] sm:$0xff] }
 0x1a3   :  { %905 = vmatpush.bf16.msrb.mxu2 %v1430_v40 }
 0x1a7   :  { %906 = vmatpush.bf16.msrb.mxu2 %v1429_v6  ;;  %v1482_v6 = vld [vmem:[%s1996_s6] ss:$0 sm:$0xff] }
 0x1a9   :  { %v656_v50 = vpop.permute.xlu1 %655  ;;  %v646_v45 = vpop.permute.xlu0 %645 }
 0x1aa   :  { %v663_v48 = vadd.f32 %v656_v50, %v651_v39  ;;  %v652_v55 = vadd.f32 %v646_v45, %v1840_v21  ;;  %v1434_v50 = vld [vmem:[%s1997_s7 + $0x10] sm:$0xff]  ;;  %v1481_v45 = vld [vmem:[%s1993_s4] ss:$0 sm:$0xff] }
 0x1ab   :  { %907 = vmatpush.bf16.msrb.mxu2 %v1428_v16  ;;  %v1483_v16 = vld [vmem:[%s1998_s8] ss:$0 sm:$0xff] }
 0x1ac   :  { %v675_v52 = vadd.f32 %v668_v57, %v663_v48 }
 0x1ae   :  { %v687_v54 = vadd.f32 %v680_v43, %v675_v52  ;;  %v1426_v43 = vld [vmem:[%s1995_s5 + $0x10] sm:$0xff]  ;;  %v1433_v52 = vld [vmem:[%s1997_s7 + $0x8] sm:$0xff] }
 0x1af   :  { %908 = vmatpush.bf16.msrb.mxu2 %v1427_v5 }
 0x1b0   :  { %v699_v59 = vadd.f32 %v692_v25, %v687_v54 }
 0x1b1   :  { %v658_v60 = vpop.permute.xlu1 %657  ;;  %v674_v0 = vpop.permute.xlu0 %673 }
 0x1b2   :  { %v664_v63 = vadd.f32 %v658_v60, %v652_v55  ;;  %v711_v3 = vadd.f32 %v704_v30, %v699_v59  ;;  %v678_v15 = vadd.f32 %v674_v0, %v666_v58  ;;  %v1424_v30 = vld [vmem:[%s1995_s5] sm:$0xff] }
 0x1b3   :  { %909 = vmatpush.bf16.msrb.mxu2 %v1426_v43 }
 0x1b4   :  { %v676_v44 = vadd.f32 %v670_v22, %v664_v63  ;;  %v723_v46 = vadd.f32 %v716_v42, %v711_v3  ;;  %v690_v53 = vadd.f32 %v686_v4, %v678_v15  ;;  %v1432_v63 = vld [vmem:[%s1997_s7] sm:$0xff] }
 0x1b5   :  { %v1444_v4 = vld [vmem:[%s1999_s9 + $0x20] sm:$0xff] }
 0x1b6   :  { %v688_v1 = vadd.f32 %v682_v34, %v676_v44  ;;  %v735_v13 = vadd.f32 %v728_v56, %v723_v46  ;;  %v1445_v46 = vld [vmem:[%s1999_s9 + $0x28] sm:$0xff] }
 0x1b7   :  { %910 = vmatpush.bf16.msrb.mxu2 %v1425_v29 }
 0x1b8   :  { %v700_v17 = vadd.f32 %v694_v28, %v688_v1 }
 0x1b9   :  { %v684_v2 = vpop.permute.xlu1 %683  ;;  %v696_v8 = vpop.permute.xlu0 %695 }
 0x1ba   :  { %v712_v21 = vadd.f32 %v706_v37, %v700_v17  ;;  %v689_v26 = vadd.f32 %v684_v2, %v677_v19  ;;  %v1435_v37 = vld [vmem:[%s1997_s7 + $0x18] sm:$0xff] }
 0x1bb   :  { %911 = vmatpush.bf16.msrb.mxu2 %v1424_v30  ;;  %v1447_v2 = vld [vmem:[%s1999_s9 + $0x38] sm:$0xff] }
 0x1bc   :  { %v724_v38 = vadd.f32 %v718_v36, %v712_v21  ;;  %v701_v27 = vadd.f32 %v696_v8, %v689_v26  ;;  %1070 = vmatpush.bf16.msra.mxu1 %v1447_v2  ;;  %v1446_v21 = vld [vmem:[%s1999_s9 + $0x30] sm:$0xff]  ;;  %v1441_v8 = vld [vmem:[%s1999_s9 + $0x8] sm:$0xff] }
 0x1be   :  { %v736_v14 = vadd.f32 %v730_v31, %v724_v38  ;;  %v713_v22 = vadd.f32 %v708_v20, %v701_v27  ;;  %v1439_v31 = vld [vmem:[%s1997_s7 + $0x38] sm:$0xff]  ;;  %v1442_v38 = vld [vmem:[%s1999_s9 + $0x10] sm:$0xff]  ;;  %v1484_v20 = vld [vmem:[%s2000_s10] ss:$0 sm:$0xff] }
 0x1bf   :  { %987 = vmatpush.bf16.msrb.mxu3 %v1439_v31 }
 0x1c0   :  { %v739_v49 = vpack.c.bf16 %v736_v14, %v735_v13  ;;  %1071 = vmatpush.bf16.msra.mxu1 %v1446_v21 }
 0x1c1   :  { %v698_v51 = vpop.permute.xlu1 %697  ;;  %v710_v9 = vpop.permute.xlu0 %709 }
 0x1c2   :  { %817 = vmatmul.bf16.vlgmr.msrb.gmra.mxu1 %v739_v49  ;;  %v702_v57 = vadd.f32 %v698_v51, %v690_v53  ;;  %v1440_v49 = vld [vmem:[%s1999_s9] sm:$0xff] }
 0x1c3   :  { %988 = vmatpush.bf16.msrb.mxu3 %v1438_v33 }
 0x1c4   :  { %v714_v12 = vadd.f32 %v710_v9, %v702_v57  ;;  %1072 = vmatpush.bf16.msra.mxu1 %v1445_v46 }
 0x1c6   :  { %v726_v34 = vadd.f32 %v722_v24, %v714_v12 }
 0x1c7   :  { %989 = vmatpush.bf16.msrb.mxu3 %v1437_v35 }
 0x1c8   :  { %1073 = vmatpush.bf16.msra.mxu1 %v1444_v4 }
 0x1c9   :  { %v720_v18 = vpop.permute.xlu1 %719  ;;  %v732_v25 = vpop.permute.xlu0 %731 }
 0x1ca   :  { %v725_v23 = vadd.f32 %v720_v18, %v713_v22 }
 0x1cb   :  { %990 = vmatpush.bf16.msrb.mxu3 %v1436_v61 }
 0x1cc   :  { %v737_v41 = vadd.f32 %v732_v25, %v725_v23  ;;  %1074 = vmatpush.bf16.msra.mxu1 %v1443_v7 }
 0x1cf   :  { %991 = vmatpush.bf16.msrb.mxu3 %v1435_v37 }
 0x1d0   :  { %1075 = vmatpush.bf16.msra.mxu1 %v1442_v38 }
 0x1d1   :  { %v734_v28 = vpop.permute.xlu1 %733 }
 0x1d2   :  { %v738_v42 = vadd.f32 %v734_v28, %v726_v34 }
 0x1d3   :  { %992 = vmatpush.bf16.msrb.mxu3 %v1434_v50 }
 0x1d4   :  { %v740_v47 = vpack.c.bf16 %v738_v42, %v737_v41  ;;  %1076 = vmatpush.bf16.msra.mxu1 %v1441_v8 }
 0x1d6   :  { %822 = vmatmul.bf16.gmra.mxu1 %v740_v47 }
 0x1d7   :  { %993 = vmatpush.bf16.msrb.mxu3 %v1433_v52 }
 0x1d8   :  { %1077 = vmatpush.bf16.msra.mxu1 %v1440_v49 }
 0x1db   :  { %994 = vmatpush.bf16.msrb.mxu3 %v1432_v63 }
 0x23f   :  { %v818_v32 = vpop.f32.mrf.mxu1 }
 0x240   :  { %v819_v54 = vadd.f32 %v1481_v45, %v818_v32 }
 0x242   :  { %v828_v0 = vmax.f32 %v819_v54, 0.0 }
 0x247   :  { %v820_v36 = vpop.f32.mrf.mxu1 }
 0x248   :  { %v821_v48 = vadd.f32 %v1481_v45, %v820_v36 }
 0x24a   :  { %v829_v60 = vmax.f32 %v821_v48, 0.0 }
 0x24c   :  { %v832_v1 = vmax.f32 %v828_v0, %v829_v60 }
 0x253   :  { %v823_v39 = vpop.f32.mrf.mxu1 }
 0x254   :  { %v824_v55 = vadd.f32 %v1481_v45, %v823_v39 }
 0x256   :  { %v830_v44 = vmax.f32 %v824_v55, 0.0 }
 0x25b   :  { %v825_v56 = vpop.f32.mrf.mxu1 }
 0x25c   :  { %v826_v59 = vadd.f32 %v1481_v45, %v825_v56 }
 0x25e   :  { %v831_v3 = vmax.f32 %v826_v59, 0.0 }
 0x260   :  { %v833_v62 = vmax.f32 %v830_v44, %v831_v3 }
 0x262   :  { %v834_v17 = vmax.f32 %v832_v1, %v833_v62 }
 0x264   :  { %v835_v40 = vpack.c.bf16 %v834_v17, %v834_v17 }
 0x266   :  { %912 = vmatmul.bf16.vlgmr.msrb.gmra.mxu2 %v835_v40 }
 0x2e9   :  { %v913_v10 = vpop.f32.mrf.mxu2 }
 0x2ea   :  { %v914_v11 = vadd.f32 %v1482_v6, %v913_v10 }
 0x2ec   :  { %v917_v13 = vmax.f32 %v914_v11, 0.0 }
 0x2ee   :  { %v918_v14 = vpack.c.bf16 %v917_v13, %v917_v13 }
 0x2f0   :  { %995 = vmatmul.bf16.vlgmr.msrb.gmra.mxu3 %v918_v14 }
 0x2f1   :  { %v915_v58 = vpop.f32.mrf.mxu2 }
 0x373   :  { %v996_v51 = vpop.f32.mrf.mxu3 }
 0x374   :  { %v997_v15 = vadd.f32 %v1483_v16, %v996_v51 }
 0x376   :  { %v1000_v19 = vmax.f32 %v997_v15, 0.0 }
 0x378   :  { %v1001_v26 = vpack.c.bf16 %v1000_v19, %v1000_v19 }
 0x37a   :  { %1078 = vmatmul.bf16.vlgmr.msra.gmra.mxu1 %v1001_v26 }
 0x37b   :  { %v998_v5 = vpop.f32.mrf.mxu3 }
 0x3f7   :  { %v1079_v53 = vpop.f32.mrf.mxu1 }
 0x3f8   :  { %v1080_v9 = vadd.f32 %v1484_v20, %v1079_v53 }
 0x3fa   :  { %1083 = vst [vmem:[%s2001_s11] sm:$0xff] %v1080_v9 }
 0x3ff   :  { %v1081_v27 = vpop.f32.mrf.mxu1 }

</bundles_post_ra>
